<compile_context>
chip_gen: v6e
topology: v6e:2x2x1
jax: 0.10.0
libtpu: 0.0.40
codegen_flags: <defaults>
</compile_context>

<pallas_src>
import functools

import jax
import jax.numpy as jnp
from jax.experimental import pallas as pl
from jax.experimental.pallas import tpu as pltpu

INPUT_DIM = 9
HIDDEN = 32
LATENT = 5

MAX_TILE_B = 2048  # rows per grid step; one tile is tiny (~72 B/row of x+y traffic)


def _round_up(n, m):
    return ((n + m - 1) // m) * m


def autoencoder_kernel(x_ref,
                       w1_ref, b1_ref,
                       w23_ref, b23_ref,
                       w4_ref, b4_ref,
                       out_ref):
    """Fused forward for one batch tile: 3 matmuls + biases + 2 ReLUs."""
    x = x_ref[...].astype(jnp.float32)

    # encoder Linear(9, 32) -> ReLU
    h1 = jnp.dot(x, w1_ref[...], preferred_element_type=jnp.float32) + b1_ref[...]
    h1 = jnp.maximum(h1, 0.0)

    # folded Linear(32, 5) @ Linear(5, 32)  ==  Linear(32, 32), then ReLU
    h2 = jnp.dot(h1, w23_ref[...], preferred_element_type=jnp.float32) + b23_ref[...]
    h2 = jnp.maximum(h2, 0.0)

    # decoder Linear(32, 9)
    y = jnp.dot(h2, w4_ref[...], preferred_element_type=jnp.float32) + b4_ref[...]

    out_ref[...] = y.astype(out_ref.dtype)


@functools.partial(jax.jit, static_argnames=())
def autoencoder_forward(x, params):
    (w1, b1, w2, b2, w3, b3, w4, b4) = params

    # Fold the two ReLU-free linears (exact): z @ w3 = (h1 @ w2 + b2) @ w3
    w23 = jnp.dot(w2, w3, preferred_element_type=jnp.float32)       # (32, 32)
    b23 = jnp.dot(b2, w3, preferred_element_type=jnp.float32) + b3  # (32,)

    # Biases as (1, N) rows for clean sublane broadcast inside the kernel.
    b1r = b1.reshape(1, HIDDEN)
    b23r = b23.reshape(1, HIDDEN)
    b4r = b4.reshape(1, INPUT_DIM)

    n = x.shape[0]
    tile_b = min(MAX_TILE_B, _round_up(max(n, 1), 8))
    n_pad = _round_up(max(n, 1), tile_b)
    if n_pad != n:
        x = jnp.pad(x, ((0, n_pad - n), (0, 0)))

    grid = (n_pad // tile_b,)

    # x / out are tiled over the batch; weights & biases are resident (constant
    # index_map -> same block every grid step, no per-step re-DMA).
    out = pl.pallas_call(
        autoencoder_kernel,
        out_shape=jax.ShapeDtypeStruct((n_pad, INPUT_DIM), x.dtype),
        grid=grid,
        in_specs=[
            pl.BlockSpec((tile_b, INPUT_DIM), lambda i: (i, 0)),     # x
            pl.BlockSpec((INPUT_DIM, HIDDEN), lambda i: (0, 0)),     # w1
            pl.BlockSpec((1, HIDDEN), lambda i: (0, 0)),             # b1
            pl.BlockSpec((HIDDEN, HIDDEN), lambda i: (0, 0)),        # w23
            pl.BlockSpec((1, HIDDEN), lambda i: (0, 0)),             # b23
            pl.BlockSpec((HIDDEN, INPUT_DIM), lambda i: (0, 0)),     # w4
            pl.BlockSpec((1, INPUT_DIM), lambda i: (0, 0)),          # b4
        ],
        out_specs=pl.BlockSpec((tile_b, INPUT_DIM), lambda i: (i, 0)),
        compiler_params=pltpu.CompilerParams(
            dimension_semantics=("parallel",)),  # megacore sharding on v7x
    )(x, w1, b1r, w23, b23r, w4, b4r)

    if n_pad != n:
        out = out[:n]
    return out


def init_params(key):
    """Deterministic init mimicking nn.Linear default: U(-1/sqrt(fan_in), ...).

    Weights stored as (in_features, out_features) for `x @ W`.
    """
    def linear_init(key, fan_in, fan_out):
        kw, kb = jax.random.split(key)
        bound = 1.0 / jnp.sqrt(float(fan_in))
        w = jax.random.uniform(kw, (fan_in, fan_out), jnp.float32, -bound, bound)
        b = jax.random.uniform(kb, (fan_out,), jnp.float32, -bound, bound)
        return w, b

    k1, k2, k3, k4 = jax.random.split(key, 4)
    w1, b1 = linear_init(k1, INPUT_DIM, HIDDEN)   # encoder Linear(9, 32)
    w2, b2 = linear_init(k2, HIDDEN, LATENT)      # encoder Linear(32, 5)
    w3, b3 = linear_init(k3, LATENT, HIDDEN)      # decoder Linear(5, 32)
    w4, b4 = linear_init(k4, HIDDEN, INPUT_DIM)   # decoder Linear(32, 9)
    return (w1, b1, w2, b2, w3, b3, w4, b4)


def reference_forward(x, params):
    """Pure-JAX reference (unfused, matches the original 4-matmul module)."""
    (w1, b1, w2, b2, w3, b3, w4, b4) = params
    h1 = jnp.maximum(x @ w1 + b1, 0.0)
    z = h1 @ w2 + b2
    h2 = jnp.maximum(z @ w3 + b3, 0.0)
    return h2 @ w4 + b4


if __name__ == "__main__":
    key = jax.random.PRNGKey(0)
    k_params, k_x1, k_x2 = jax.random.split(key, 3)

    params = init_params(k_params)

    # Small primary check.
    batch = 8
    x = jax.random.normal(k_x1, (batch, INPUT_DIM), dtype=jnp.float32)
    out = jax.block_until_ready(autoencoder_forward(x, params))
    ref = reference_forward(x, params)
    assert out.shape == (batch, INPUT_DIM), out.shape
    assert jnp.allclose(out, ref, atol=1e-4, rtol=1e-4), "mismatch vs reference (batch=8)"

    # Secondary check: batch not a multiple of the tile (exercises padding path).
    batch2 = 2500
    x2 = jax.random.normal(k_x2, (batch2, INPUT_DIM), dtype=jnp.float32)
    out2 = jax.block_until_ready(autoencoder_forward(x2, params))
    ref2 = reference_forward(x2, params)
    assert out2.shape == (batch2, INPUT_DIM), out2.shape
    assert jnp.allclose(out2, ref2, atol=1e-4, rtol=1e-4), "mismatch vs reference (batch=2500)"

    print("KERNEL_OK")
</pallas_src>

<mosaic_0001>
module attributes {stable_mosaic.version = 11 : i64} {
  func.func @autoencoder_kernel(%arg0: i32, %arg1: memref<8x9xf32, #tpu.memory_space<vmem>>, %arg2: memref<9x32xf32, #tpu.memory_space<vmem>>, %arg3: memref<1x32xf32, #tpu.memory_space<vmem>>, %arg4: memref<32x32xf32, #tpu.memory_space<vmem>>, %arg5: memref<1x32xf32, #tpu.memory_space<vmem>>, %arg6: memref<32x9xf32, #tpu.memory_space<vmem>>, %arg7: memref<1x9xf32, #tpu.memory_space<vmem>>, %arg8: memref<8x9xf32, #tpu.memory_space<vmem>>) attributes {dimension_semantics = [#tpu.dimension_semantics<parallel>], iteration_bounds = array<i64: 1>, scalar_prefetch = 0 : i64, scratch_operands = 0 : i64, tpu.core_type = #tpu.core_type<tc>, window_params = [{transform_indices = @transform_0, window_bounds = array<i64: 8, 9>}, {pipeline_mode = #tpu.pipeline_mode<synchronous>, transform_indices = @transform_1, window_bounds = array<i64: 9, 32>}, {pipeline_mode = #tpu.pipeline_mode<synchronous>, transform_indices = @transform_2, window_bounds = array<i64: 1, 32>}, {pipeline_mode = #tpu.pipeline_mode<synchronous>, transform_indices = @transform_3, window_bounds = array<i64: 32, 32>}, {pipeline_mode = #tpu.pipeline_mode<synchronous>, transform_indices = @transform_4, window_bounds = array<i64: 1, 32>}, {pipeline_mode = #tpu.pipeline_mode<synchronous>, transform_indices = @transform_5, window_bounds = array<i64: 32, 9>}, {pipeline_mode = #tpu.pipeline_mode<synchronous>, transform_indices = @transform_6, window_bounds = array<i64: 1, 9>}, {transform_indices = @transform_7, window_bounds = array<i64: 8, 9>}]} {
    %c0 = arith.constant 0 : index
    %c0_0 = arith.constant 0 : index
    %0 = vector.load %arg1[%c0, %c0_0] : memref<8x9xf32, #tpu.memory_space<vmem>>, vector<8x9xf32>
    %c0_1 = arith.constant 0 : index
    %c0_2 = arith.constant 0 : index
    %1 = vector.load %arg2[%c0_1, %c0_2] : memref<9x32xf32, #tpu.memory_space<vmem>>, vector<9x32xf32>
    %cst = arith.constant dense<0.000000e+00> : vector<8x32xf32>
    %2 = tpu.matmul %0, %1, %cst {dimension_numbers = #tpu.dot_dimension_numbers<[1], [0], [0], [1], [0, 0, 1, 1], [], []>} : vector<8x9xf32>, vector<9x32xf32>, vector<8x32xf32> -> vector<8x32xf32>
    %c0_3 = arith.constant 0 : index
    %c0_4 = arith.constant 0 : index
    %3 = vector.load %arg3[%c0_3, %c0_4] : memref<1x32xf32, #tpu.memory_space<vmem>>, vector<1x32xf32>
    %4 = vector.broadcast %3 : vector<1x32xf32> to vector<8x32xf32>
    %5 = arith.addf %2, %4 : vector<8x32xf32>
    %cst_5 = arith.constant 0.000000e+00 : f32
    %6 = vector.broadcast %cst_5 : f32 to vector<8x32xf32>
    %7 = arith.maximumf %5, %6 : vector<8x32xf32>
    %c0_6 = arith.constant 0 : index
    %c0_7 = arith.constant 0 : index
    %8 = vector.load %arg4[%c0_6, %c0_7] : memref<32x32xf32, #tpu.memory_space<vmem>>, vector<32x32xf32>
    %cst_8 = arith.constant dense<0.000000e+00> : vector<8x32xf32>
    %9 = tpu.matmul %7, %8, %cst_8 {dimension_numbers = #tpu.dot_dimension_numbers<[1], [0], [0], [1], [0, 0, 1, 1], [], []>} : vector<8x32xf32>, vector<32x32xf32>, vector<8x32xf32> -> vector<8x32xf32>
    %c0_9 = arith.constant 0 : index
    %c0_10 = arith.constant 0 : index
    %10 = vector.load %arg5[%c0_9, %c0_10] : memref<1x32xf32, #tpu.memory_space<vmem>>, vector<1x32xf32>
    %11 = vector.broadcast %10 : vector<1x32xf32> to vector<8x32xf32>
    %12 = arith.addf %9, %11 : vector<8x32xf32>
    %cst_11 = arith.constant 0.000000e+00 : f32
    %13 = vector.broadcast %cst_11 : f32 to vector<8x32xf32>
    %14 = arith.maximumf %12, %13 : vector<8x32xf32>
    %c0_12 = arith.constant 0 : index
    %c0_13 = arith.constant 0 : index
    %15 = vector.load %arg6[%c0_12, %c0_13] : memref<32x9xf32, #tpu.memory_space<vmem>>, vector<32x9xf32>
    %cst_14 = arith.constant dense<0.000000e+00> : vector<8x9xf32>
    %16 = tpu.matmul %14, %15, %cst_14 {dimension_numbers = #tpu.dot_dimension_numbers<[1], [0], [0], [1], [0, 0, 1, 1], [], []>} : vector<8x32xf32>, vector<32x9xf32>, vector<8x9xf32> -> vector<8x9xf32>
    %c0_15 = arith.constant 0 : index
    %c0_16 = arith.constant 0 : index
    %17 = vector.load %arg7[%c0_15, %c0_16] : memref<1x9xf32, #tpu.memory_space<vmem>>, vector<1x9xf32>
    %18 = vector.broadcast %17 : vector<1x9xf32> to vector<8x9xf32>
    %19 = arith.addf %16, %18 : vector<8x9xf32>
    %c0_17 = arith.constant 0 : index
    %c0_18 = arith.constant 0 : index
    %20 = vector.load %arg8[%c0_17, %c0_18] : memref<8x9xf32, #tpu.memory_space<vmem>>, vector<8x9xf32>
    tpu.vector_store %arg8[%c0_17, %c0_18], %19 {strides = array<i32>} : memref<8x9xf32, #tpu.memory_space<vmem>>, vector<8x9xf32>,
    return
  }
  func.func @transform_0(%arg0: i32) -> (i32, i32) {
    %c0_i32 = arith.constant 0 : i32
    %c0_i32_0 = arith.constant 0 : i32
    return %arg0, %c0_i32 : i32, i32
  }
  func.func @transform_1(%arg0: i32) -> (i32, i32) {
    %c0_i32 = arith.constant 0 : i32
    %c0_i32_0 = arith.constant 0 : i32
    %c0_i32_1 = arith.constant 0 : i32
    return %c0_i32, %c0_i32_0 : i32, i32
  }
  func.func @transform_2(%arg0: i32) -> (i32, i32) {
    %c0_i32 = arith.constant 0 : i32
    %c0_i32_0 = arith.constant 0 : i32
    %c0_i32_1 = arith.constant 0 : i32
    return %c0_i32, %c0_i32_0 : i32, i32
  }
  func.func @transform_3(%arg0: i32) -> (i32, i32) {
    %c0_i32 = arith.constant 0 : i32
    %c0_i32_0 = arith.constant 0 : i32
    %c0_i32_1 = arith.constant 0 : i32
    return %c0_i32, %c0_i32_0 : i32, i32
  }
  func.func @transform_4(%arg0: i32) -> (i32, i32) {
    %c0_i32 = arith.constant 0 : i32
    %c0_i32_0 = arith.constant 0 : i32
    %c0_i32_1 = arith.constant 0 : i32
    return %c0_i32, %c0_i32_0 : i32, i32
  }
  func.func @transform_5(%arg0: i32) -> (i32, i32) {
    %c0_i32 = arith.constant 0 : i32
    %c0_i32_0 = arith.constant 0 : i32
    %c0_i32_1 = arith.constant 0 : i32
    return %c0_i32, %c0_i32_0 : i32, i32
  }
  func.func @transform_6(%arg0: i32) -> (i32, i32) {
    %c0_i32 = arith.constant 0 : i32
    %c0_i32_0 = arith.constant 0 : i32
    %c0_i32_1 = arith.constant 0 : i32
    return %c0_i32, %c0_i32_0 : i32, i32
  }
  func.func @transform_7(%arg0: i32) -> (i32, i32) {
    %c0_i32 = arith.constant 0 : i32
    %c0_i32_0 = arith.constant 0 : i32
    return %arg0, %c0_i32 : i32, i32
  }
}

</mosaic_0001>

<bundles_post_ra>
// kernel: autoencoder_forward.1
= control target key start
LH: loop header
LB: loop body
LE: loop exit
PB: predicated region body
PF: predicated region fallthrough
CT: control target
= control target key end

     0   :  { %vm41_vm0 = vcmask 1040384   ;;  %v375_v1 = vmov 0.0   ;;  %vm376_vm1 = vmmov 0   ;;  %vm37_vm2 = vcmask 72704   ;;  %s467_s0 = inlined_call_operand.vmem [shape: f32[8,9], index: 0, kind: input, shape index: {}]   ;;  %s468_s1 = inlined_call_operand.vmem [shape: f32[9,32], index: 1, kind: input, shape index: {}]   ;;  %s469_s2 = inlined_call_operand.vmem [shape: f32[1,32], index: 2, kind: input, shape index: {}]   ;;  %s470_s3 = inlined_call_operand.vmem [shape: f32[32,32], index: 3, kind: input, shape index: {}]   ;;  %s471_s4 = inlined_call_operand.vmem [shape: f32[1,32], index: 4, kind: input, shape index: {}]   ;;  %s472_s5 = inlined_call_operand.vmem [shape: f32[32,9], index: 5, kind: input, shape index: {}]   ;;  %s473_s6 = inlined_call_operand.vmem [shape: f32[1,9], index: 6, kind: input, shape index: {}]   ;;  %s474_s7 = inlined_call_operand.hbm [shape: f32[8,9], index: 7, kind: output, shape index: {}]  }
   0x1   :  { %v29_v0 = vld [vmem:[%s468_s1 + $0x8] sm:$0x1]  ;;  %321 = vmatprep.subr.mxu0 %v375_v1  ;;  %v28_v2 = vld [vmem:[%s468_s1] sm:$0xff]  ;;  %325 = vmatprep.mubr.msk.f32.mxu0 %vm376_vm1, %v375_v1  ;;  %v119_v3 = vld [vmem:[%s470_s3 + $0x18] sm:$0xff] }
   0x2   :  { %322 = vmatpush3.msk.msra.mxu0 %vm41_vm0, %v29_v0  ;;  %v27_v4 = vld [vmem:[%s467_s0] sm:$0xff]  ;;  %328 = vmatprep.subr.mxu1 %v375_v1 }
   0x3   :  { %12 = vsyncpa [#allocation3], 0  ;;  %323 = vmatprep.subr.mxu0 %v375_v1  ;;  %329 = vmatpush3.msra.mxu1 %v119_v3  ;;  %v118_v5 = vld [vmem:[%s470_s3 + $0x10] sm:$0xff]  ;;  %v117_v6 = vld [vmem:[%s470_s3 + $0x8] sm:$0xff]  ;;  %vm127_vm3 = vcmask 261120   ;;  %s377_s25 = smov [#allocation2]  }
   0x4   :  { %324 = vmatpush3.msra.mxu0 %v28_v2  ;;  %330 = vmatprep.subr.mxu1 %v375_v1  ;;  %v116_v7 = vld [vmem:[%s470_s3] sm:$0xff]  ;;  %v205_v8 = vld [vmem:[%s472_s5 + $0x18] sm:$0xff]  ;;  %v204_v14 = vld [vmem:[%s472_s5 + $0x10] sm:$0xff]  ;;  %s293_s26 = sshll.u32 %s377_s25, 4  ;;  %s294_s26 = int_to_ptr.vmem [resolvable:$true] %s293_s26 }
   0x5   :  { %326 = vmatmul.mubr.msk.f32.vlgmr.msra.gmra.mxu0 %vm37_vm2, %v27_v4  ;;  %336 = vmatprep.mubr.msk.f32.mxu1 %vm376_vm1, %v375_v1  ;;  %v301_v9 = vld [vmem:[%s469_s2] ss:$0 sm:$0xff]  ;;  %v203_v15 = vld [vmem:[%s472_s5 + $0x8] sm:$0xff]  ;;  %p358_p1 = scmp.lt.s32.totalorder %s294_s26, %s294_s26 }
   0x6   :  { %339 = vmatprep.subr.mxu0 %v375_v1  ;;  %347 = vmatprep.mubr.msk.f32.mxu0 %vm376_vm1, %v375_v1  ;;  %v202_v16 = vld [vmem:[%s472_s5] sm:$0xff]  ;;  %s353_s5 = scalar_lea.vmem %s294_s26, 128 }
   0x7   :  { %331 = vmatpush3.msra.mxu1 %v118_v5  ;;  %340 = vmatpush3.msra.mxu0 %v205_v8  ;;  %v304_v17 = vld [vmem:[%s471_s4] ss:$0 sm:$0xff]  ;;  %p354_p0 = scmp.ne.s32.totalorder %s294_s26, %s353_s5  ;;  %p359_p2 = scmp.lt.s32.totalorder %s353_s5, %s353_s5 }
   0x8   :  { %332 = vmatprep.subr.mxu1 %v375_v1  ;;  %341 = vmatprep.subr.mxu0 %v375_v1  ;;  %v306_v22 = vld [vmem:[%s473_s6] ss:$0 sm:$0xff] }
   0x9   :  { %333 = vmatpush3.msra.mxu1 %v117_v6  ;;  %342 = vmatpush3.msra.mxu0 %v204_v14  ;;  %p360_p3 = por %p359_p2, %p358_p1 }
   0xa   :  { %334 = vmatprep.subr.mxu1 %v375_v1  ;;  %343 = vmatprep.subr.mxu0 %v375_v1 }
   0xb   :  { %335 = vmatpush3.msra.mxu1 %v116_v7  ;;  %344 = vmatpush3.msra.mxu0 %v203_v15  ;;  %p361_p4 = pnand %p360_p3, %p354_p0 }
   0xc   :  { %345 = vmatprep.subr.mxu0 %v375_v1 }
   0xd   :  { %346 = vmatpush3.msra.mxu0 %v202_v16 }
  0xc5   :  { %v111_v10 = vpop.f32.mrf.mxu0 }
  0xc6   :  { %v112_v11 = vadd.f32 %v301_v9, %v111_v10 }
  0xc7   :  { %v327_v12 = vpop.f32.mrf.mxu0 }
  0xc8   :  { %v115_v13 = vmax.f32 %v112_v11, 0.0 }
  0xca   :  { %337 = vmatmul.mubr.msk.f32.vlgmr.msra.gmra.mxu1 %vm127_vm3, %v115_v13 }
 0x18a   :  { %v197_v18 = vpop.f32.mrf.mxu1 }
 0x18b   :  { %v198_v19 = vadd.f32 %v304_v17, %v197_v18 }
 0x18c   :  { %v338_v20 = vpop.f32.mrf.mxu1 }
 0x18d   :  { %v201_v21 = vmax.f32 %v198_v19, 0.0 }
 0x18f   :  { %348 = vmatmul.mubr.msk.f32.vlgmr.msra.gmra.mxu0 %vm127_vm3, %v201_v21 }
 0x24f   :  { %v282_v23 = vpop.f32.mrf.mxu0 }
 0x250   :  { %v283_v24 = vadd.f32 %v306_v22, %v282_v23 }
 0x251   :  { %v349_v25 = vpop.f32.mrf.mxu0 }
 0x252   :  { %286 = vst.msk [vmem:[#allocation2] sm:$0xff] %vm37_vm2, %v283_v24 }
 0x253   :  { %364 = shalt.err (!%p361_p4)
}
 0x254   :  { %296 = dma.vmem_to_hbm [thread:$0]  %s294_s26, 128, %s474_s7, [#allocation3]  }
 0x255   :  { %373 = dma.done.wait [#allocation3], 128  }
 0x256   :  { %374 = vsyncadd [#allocation3], 4294967168 }
 0x257   :  { %300 = vsyncpa [#allocation3], 1 }

</bundles_post_ra>
